<compile_context>
chip_gen: v6e
topology: v6e:2x2x1
jax: 0.10.0
libtpu: 0.0.40
codegen_flags: <defaults>
</compile_context>

<pallas_src>
import math

import jax
import jax.numpy as jnp
from jax.experimental import pallas as pl
from jax.experimental.pallas import tpu as pltpu

LANE = 128


def _round_up(x, m):
    return (x + m - 1) // m * m


def vfunction_kernel(s_ref, w1_ref, b1_ref, w2_ref, b2_ref, w3t_ref, b3_ref, o_ref):
    # s_ref:  (bm, s_dim)
    # w1:     (s_dim, h1)   b1: (1, h1)
    # w2:     (h1, h2p)     b2: (1, h2p)   (h2 zero-padded to 128 lanes)
    # w3t:    (1, h2p)      b3: (1, 1)     (last layer as a row vector)
    # o_ref:  (bm, 1)
    x = s_ref[...]
    h1 = jnp.dot(x, w1_ref[...], preferred_element_type=jnp.float32) + b1_ref[...]
    h1 = jnp.maximum(h1, 0.0)
    h2 = jnp.dot(h1.astype(w2_ref.dtype), w2_ref[...],
                 preferred_element_type=jnp.float32) + b2_ref[...]
    h2 = jnp.maximum(h2, 0.0)
    # 64->1 layer as VPU multiply + lane reduction (no MXU matmul, 4 B/row out).
    v = jnp.sum(h2 * w3t_ref[...], axis=-1, keepdims=True) + b3_ref[...]
    o_ref[...] = v.astype(o_ref.dtype)


def vfunction_forward(s, padded_params, *, bm=1024, use_bf16=False):
    """Pallas equivalent of VFunction.forward(s). Returns (B, 1) float32."""
    w1, b1, w2, b2, w3t, b3 = padded_params
    B, s_dim = s.shape
    h1 = w1.shape[1]
    h2p = w2.shape[1]

    if use_bf16:
        # Optional fast path (v6e/v7x): bf16 MXU operands, f32 accumulation.
        s = s.astype(jnp.bfloat16)

    # Batch tile: big (fewer grid steps), 8-aligned, and at least 2 grid steps
    # whenever B >= 16 so v7x's two TensorCores both get work.
    if B < 8:
        bm_eff = B  # block equals full batch dim -> legal without 8-alignment
    else:
        bm_eff = max(8, min(bm, _round_up(pl.cdiv(B, 2), 8)))
    grid = (pl.cdiv(B, bm_eff),)

    full = lambda i: (0, 0)  # weights/biases: whole array resident every step

    weight_bytes = sum(int(a.size) * a.dtype.itemsize for a in (w1, b1, w2, b2, w3t, b3))
    cost = pl.CostEstimate(
        flops=2 * B * (s_dim * h1 + h1 * h2p + h2p),
        transcendentals=0,
        bytes_accessed=B * s_dim * s.dtype.itemsize + B * 4 + weight_bytes,
    )

    out = pl.pallas_call(
        vfunction_kernel,
        out_shape=jax.ShapeDtypeStruct((B, 1), jnp.float32),
        grid_spec=pltpu.PrefetchScalarGridSpec(
            num_scalar_prefetch=0,
            grid=grid,
            in_specs=[
                pl.BlockSpec((bm_eff, s_dim), lambda i: (i, 0)),  # s tile
                pl.BlockSpec((s_dim, h1), full),                  # W1
                pl.BlockSpec((1, h1), full),                      # b1
                pl.BlockSpec((h1, h2p), full),                    # W2 (padded cols)
                pl.BlockSpec((1, h2p), full),                     # b2 (padded)
                pl.BlockSpec((1, h2p), full),                     # W3^T row (padded)
                pl.BlockSpec((1, 1), full),                       # b3
            ],
            out_specs=pl.BlockSpec((bm_eff, 1), lambda i: (i, 0)),
        ),
        compiler_params=pltpu.CompilerParams(
            dimension_semantics=("parallel",),
        ),
        cost_estimate=cost,
    )(s, w1, b1, w2, b2, w3t, b3)

    return out


def init_vfunction_params(key, s_dim, hidden_units=(128, 64)):
    """nn.Linear-style init (uniform +-1/sqrt(fan_in)).

    Weights as (in_features, out_features); biases as (1, out_features).
    """
    dims = [s_dim, hidden_units[0], hidden_units[1], 1]
    params = []
    for i in range(3):
        fan_in, fan_out = dims[i], dims[i + 1]
        key, kw, kb = jax.random.split(key, 3)
        bound = 1.0 / math.sqrt(fan_in)
        w = jax.random.uniform(kw, (fan_in, fan_out), jnp.float32, -bound, bound)
        b = jax.random.uniform(kb, (1, fan_out), jnp.float32, -bound, bound)
        params += [w, b]
    return tuple(params)


def pad_params_for_kernel(params, lane=LANE, use_bf16=False):
    """Zero-pad h2 to 128 lanes (exact) and express W3 as a (1, h2p) row."""
    w1, b1, w2, b2, w3, b3 = params
    h2 = w2.shape[1]
    h2p = _round_up(h2, lane)
    w2p = jnp.pad(w2, ((0, 0), (0, h2p - h2)))
    b2p = jnp.pad(b2, ((0, 0), (0, h2p - h2)))
    w3t = jnp.pad(w3.T, ((0, 0), (0, h2p - h2)))   # (1, h2p), padded lanes = 0
    if use_bf16:
        w1 = w1.astype(jnp.bfloat16)
        w2p = w2p.astype(jnp.bfloat16)
    return (w1, b1, w2p, b2p, w3t, b3)


def vfunction_reference(s, params):
    w1, b1, w2, b2, w3, b3 = params
    h1 = jnp.maximum(s @ w1 + b1, 0.0)
    h2 = jnp.maximum(h1 @ w2 + b2, 0.0)
    return h2 @ w3 + b3


if __name__ == "__main__":
    key = jax.random.PRNGKey(0)
    k_params, k_s1, k_s2 = jax.random.split(key, 3)

    s_dim = 16
    params = init_vfunction_params(k_params, s_dim, hidden_units=(128, 64))
    padded = pad_params_for_kernel(params)

    # Even batch (two grid steps on the "parallel" axis).
    s = jax.random.normal(k_s1, (32, s_dim), jnp.float32)
    v = jax.block_until_ready(vfunction_forward(s, padded))
    v_ref = vfunction_reference(s, params)
    assert v.shape == (32, 1), v.shape
    assert jnp.allclose(v, v_ref, atol=1e-4, rtol=1e-4)

    # Ragged batch: no wrapper-side padding, partial boundary block in-kernel.
    s2 = jax.random.normal(k_s2, (13, s_dim), jnp.float32)
    v2 = jax.block_until_ready(vfunction_forward(s2, padded))
    v2_ref = vfunction_reference(s2, params)
    assert v2.shape == (13, 1), v2.shape
    assert jnp.allclose(v2, v2_ref, atol=1e-4, rtol=1e-4)

    print("KERNEL_OK")
</pallas_src>

<mosaic_0001>
module attributes {stable_mosaic.version = 11 : i64} {
  func.func @vfunction_kernel(%arg0: i32, %arg1: memref<16x16xf32, #tpu.memory_space<vmem>>, %arg2: memref<16x128xf32, #tpu.memory_space<vmem>>, %arg3: memref<1x128xf32, #tpu.memory_space<vmem>>, %arg4: memref<128x128xf32, #tpu.memory_space<vmem>>, %arg5: memref<1x128xf32, #tpu.memory_space<vmem>>, %arg6: memref<1x128xf32, #tpu.memory_space<vmem>>, %arg7: memref<1x1xf32, #tpu.memory_space<vmem>>, %arg8: memref<16x1xf32, #tpu.memory_space<vmem>>) attributes {dimension_semantics = [#tpu.dimension_semantics<parallel>], iteration_bounds = array<i64: 2>, scalar_prefetch = 0 : i64, scratch_operands = 0 : i64, tpu.core_type = #tpu.core_type<tc>, window_params = [{transform_indices = @transform_0, window_bounds = array<i64: 16, 16>}, {pipeline_mode = #tpu.pipeline_mode<synchronous>, transform_indices = @transform_1, window_bounds = array<i64: 16, 128>}, {pipeline_mode = #tpu.pipeline_mode<synchronous>, transform_indices = @transform_2, window_bounds = array<i64: 1, 128>}, {pipeline_mode = #tpu.pipeline_mode<synchronous>, transform_indices = @transform_3, window_bounds = array<i64: 128, 128>}, {pipeline_mode = #tpu.pipeline_mode<synchronous>, transform_indices = @transform_4, window_bounds = array<i64: 1, 128>}, {pipeline_mode = #tpu.pipeline_mode<synchronous>, transform_indices = @transform_5, window_bounds = array<i64: 1, 128>}, {pipeline_mode = #tpu.pipeline_mode<synchronous>, transform_indices = @transform_6, window_bounds = array<i64: 1, 1>}, {transform_indices = @transform_7, window_bounds = array<i64: 16, 1>}]} {
    %c0 = arith.constant 0 : index
    %c0_0 = arith.constant 0 : index
    %0 = vector.load %arg1[%c0, %c0_0] : memref<16x16xf32, #tpu.memory_space<vmem>>, vector<16x16xf32>
    %c0_1 = arith.constant 0 : index
    %c0_2 = arith.constant 0 : index
    %1 = vector.load %arg2[%c0_1, %c0_2] : memref<16x128xf32, #tpu.memory_space<vmem>>, vector<16x128xf32>
    %cst = arith.constant dense<0.000000e+00> : vector<16x128xf32>
    %2 = tpu.matmul %0, %1, %cst {dimension_numbers = #tpu.dot_dimension_numbers<[1], [0], [0], [1], [0, 0, 1, 1], [], []>} : vector<16x16xf32>, vector<16x128xf32>, vector<16x128xf32> -> vector<16x128xf32>
    %c0_3 = arith.constant 0 : index
    %c0_4 = arith.constant 0 : index
    %3 = vector.load %arg3[%c0_3, %c0_4] : memref<1x128xf32, #tpu.memory_space<vmem>>, vector<1x128xf32>
    %4 = vector.broadcast %3 : vector<1x128xf32> to vector<16x128xf32>
    %5 = arith.addf %2, %4 : vector<16x128xf32>
    %cst_5 = arith.constant 0.000000e+00 : f32
    %6 = vector.broadcast %cst_5 : f32 to vector<16x128xf32>
    %7 = arith.maximumf %5, %6 : vector<16x128xf32>
    %c0_6 = arith.constant 0 : index
    %c0_7 = arith.constant 0 : index
    %8 = vector.load %arg4[%c0_6, %c0_7] : memref<128x128xf32, #tpu.memory_space<vmem>>, vector<128x128xf32>
    %cst_8 = arith.constant dense<0.000000e+00> : vector<16x128xf32>
    %9 = tpu.matmul %7, %8, %cst_8 {dimension_numbers = #tpu.dot_dimension_numbers<[1], [0], [0], [1], [0, 0, 1, 1], [], []>} : vector<16x128xf32>, vector<128x128xf32>, vector<16x128xf32> -> vector<16x128xf32>
    %c0_9 = arith.constant 0 : index
    %c0_10 = arith.constant 0 : index
    %10 = vector.load %arg5[%c0_9, %c0_10] : memref<1x128xf32, #tpu.memory_space<vmem>>, vector<1x128xf32>
    %11 = vector.broadcast %10 : vector<1x128xf32> to vector<16x128xf32>
    %12 = arith.addf %9, %11 : vector<16x128xf32>
    %cst_11 = arith.constant 0.000000e+00 : f32
    %13 = vector.broadcast %cst_11 : f32 to vector<16x128xf32>
    %14 = arith.maximumf %12, %13 : vector<16x128xf32>
    %c0_12 = arith.constant 0 : index
    %c0_13 = arith.constant 0 : index
    %15 = vector.load %arg6[%c0_12, %c0_13] : memref<1x128xf32, #tpu.memory_space<vmem>>, vector<1x128xf32>
    %16 = vector.broadcast %15 : vector<1x128xf32> to vector<16x128xf32>
    %17 = arith.mulf %14, %16 : vector<16x128xf32>
    %cst_14 = arith.constant dense<0.000000e+00> : vector<16xf32>
    %18 = vector.multi_reduction <add>, %17, %cst_14 [1] : vector<16x128xf32> to vector<16xf32>
    %19 = vector.shape_cast %18 : vector<16xf32> to vector<16x1xf32>
    %c0_15 = arith.constant 0 : index
    %c0_16 = arith.constant 0 : index
    %20 = vector.load %arg7[%c0_15, %c0_16] : memref<1x1xf32, #tpu.memory_space<vmem>>, vector<1x1xf32>
    %21 = vector.broadcast %20 : vector<1x1xf32> to vector<16x1xf32>
    %22 = arith.addf %19, %21 : vector<16x1xf32>
    %c0_17 = arith.constant 0 : index
    %c0_18 = arith.constant 0 : index
    %23 = vector.load %arg8[%c0_17, %c0_18] : memref<16x1xf32, #tpu.memory_space<vmem>>, vector<16x1xf32>
    tpu.vector_store %arg8[%c0_17, %c0_18], %22 {strides = array<i32>} : memref<16x1xf32, #tpu.memory_space<vmem>>, vector<16x1xf32>,
    return
  }
  func.func @transform_0(%arg0: i32) -> (i32, i32) {
    %c0_i32 = arith.constant 0 : i32
    %c0_i32_0 = arith.constant 0 : i32
    return %arg0, %c0_i32 : i32, i32
  }
  func.func @transform_1(%arg0: i32) -> (i32, i32) {
    %c0_i32 = arith.constant 0 : i32
    %c0_i32_0 = arith.constant 0 : i32
    %c0_i32_1 = arith.constant 0 : i32
    return %c0_i32, %c0_i32_0 : i32, i32
  }
  func.func @transform_2(%arg0: i32) -> (i32, i32) {
    %c0_i32 = arith.constant 0 : i32
    %c0_i32_0 = arith.constant 0 : i32
    %c0_i32_1 = arith.constant 0 : i32
    return %c0_i32, %c0_i32_0 : i32, i32
  }
  func.func @transform_3(%arg0: i32) -> (i32, i32) {
    %c0_i32 = arith.constant 0 : i32
    %c0_i32_0 = arith.constant 0 : i32
    %c0_i32_1 = arith.constant 0 : i32
    return %c0_i32, %c0_i32_0 : i32, i32
  }
  func.func @transform_4(%arg0: i32) -> (i32, i32) {
    %c0_i32 = arith.constant 0 : i32
    %c0_i32_0 = arith.constant 0 : i32
    %c0_i32_1 = arith.constant 0 : i32
    return %c0_i32, %c0_i32_0 : i32, i32
  }
  func.func @transform_5(%arg0: i32) -> (i32, i32) {
    %c0_i32 = arith.constant 0 : i32
    %c0_i32_0 = arith.constant 0 : i32
    %c0_i32_1 = arith.constant 0 : i32
    return %c0_i32, %c0_i32_0 : i32, i32
  }
  func.func @transform_6(%arg0: i32) -> (i32, i32) {
    %c0_i32 = arith.constant 0 : i32
    %c0_i32_0 = arith.constant 0 : i32
    %c0_i32_1 = arith.constant 0 : i32
    return %c0_i32, %c0_i32_0 : i32, i32
  }
  func.func @transform_7(%arg0: i32) -> (i32, i32) {
    %c0_i32 = arith.constant 0 : i32
    %c0_i32_0 = arith.constant 0 : i32
    return %arg0, %c0_i32 : i32, i32
  }
}

</mosaic_0001>

<bundles_post_ra>
// kernel: tpu_custom_call.1
= control target key start
LH: loop header
LB: loop body
LE: loop exit
PB: predicated region body
PF: predicated region fallthrough
CT: control target
= control target key end

     0   :  { %s837_s0 = inlined_call_operand.vmem [shape: f32[32,16], index: 0, kind: input, shape index: {}]   ;;  %s838_s1 = inlined_call_operand.vmem [shape: f32[16,128], index: 1, kind: input, shape index: {}]   ;;  %s839_s2 = inlined_call_operand.vmem [shape: f32[1,128], index: 2, kind: input, shape index: {}]   ;;  %s840_s3 = inlined_call_operand.hbm [shape: f32[128,128], index: 3, kind: input, shape index: {}]   ;;  %s841_s4 = inlined_call_operand.vmem [shape: f32[1,128], index: 4, kind: input, shape index: {}]   ;;  %s842_s5 = inlined_call_operand.vmem [shape: f32[1,128], index: 5, kind: input, shape index: {}]   ;;  %s843_s6 = inlined_call_operand.<no memory space> [shape: f32[1,1], index: 6, kind: input, shape index: {}]   ;;  %s844_s7 = inlined_call_operand.vmem [shape: f32[32,1], index: 7, kind: output, shape index: {}]  }
   0x1   :  { %v12_v0 = vstv %s843_s6 }
   0x2   :  { %13 = vst [vmem:[#allocation2] sm:$0x1] %v12_v0 }
   0x3   :  { %14 = vsyncpa [#allocation4], 0  ;;  %s775_s26 = smov 0  }
   0x4 LB: > { %s587_s27 = sadd.s32 4294967295, %s727_s26   ;;  %p589_p0 = scmp.ge.s32.totalorder %s727_s26, 1  ;;  %s727_s26 = sphi %s775_s26, %s20_s26  }
   0x5   : > { %p203_p1 = scmp.lt.s32.totalorder %s727_s26, 3  ;;  %s729_s28 = smov [#allocation3]  }
   0x6   : > { %s221_s29 = sshll.u32 %s729_s28, 4  ;;  %p787_p3 = scmp.eq.s32.totalorder %s587_s27, 0  ;;  %s222_s29 = int_to_ptr.vmem [resolvable:$true] %s221_s29 }
   0x7   : > { %p783_p2 = pnand %p589_p0, %p203_p1  ;;  %s702_s8 = scalar_lea.vmem %s222_s29, 2048 }
   0x8   : > { %p703_p7 = scmp.ne.s32.totalorder %s222_s29, %s702_s8  ;;  %p710_p10 = scmp.lt.s32.totalorder %s222_s29, %s222_s29 }
   0x9   : > { %p674_p4 = pneg %p783_p2  ;;  %p711_p11 = scmp.lt.s32.totalorder %s702_s8, %s702_s8 }
   0xb   : > { %p675_p5 = pnand %p787_p3, %p674_p4  ;;  %p712_p12 = por %p711_p11, %p710_p10 }
   0xd   : > { %p693_p6 = pneg %p675_p5 }
   0xf   : > { %p705_p8 = pnand %p703_p7, %p693_p6 }
  0x11   : > { %p706_p9 = pneg %p705_p8 }
  0x13   : > { %p713_p13 = pnand %p712_p12, %p706_p9 }
  0x15   : > { %716 = shalt.err (!%p713_p13)
}
  0x16   : > { %s730_s9 = smov 128   ;;  %s731_s10 = smov 8  }
  0x17   : > { %677 = dma.hbm_to_vmem [thread:$0]  (!%p675_p5), %s840_s3, 2048, %s222_s29, [#allocation4], %s730_s9, %s730_s9, %s731_s10  }
  0x18   : > { %255 = sbr.rel (%p783_p2) target bundleno = 584 (0x248), region = 48 }
  0x1d   : > { %722 = dma.done.wait (%p787_p3), [#allocation4], 2048  }
  0x1e   : > { %724 = vsyncadd (%p787_p3), [#allocation4], 4294965248  ;;  %s594_s13 = sshll.u32 %s587_s27, 1  ;;  %vm310_vm0 = vcmask 130048   ;;  %v302_v1 = vld [vmem:[%s838_s1 + $0x8] sm:$0xff]  ;;  %v301_v2 = vld [vmem:[%s838_s1] sm:$0xff] }
  0x1f   : > { %p288_p0 = scmp.lt.s32.totalorder %s594_s13, 3  ;;  %628 = vmatprep.subr.mxu0 %v302_v1  ;;  %v409_v4 = vld [vmem:[#allocation3 + $0x78] sm:$0xff]  ;;  %v408_v5 = vld [vmem:[#allocation3 + $0x70] sm:$0xff]  ;;  %v407_v7 = vld [vmem:[#allocation3 + $0x68] sm:$0xff]  ;;  %vm516_vm1 = vcmask 7168  }
  0x20   : > { %629 = vmatpush3.msra.mxu0 %v302_v1  ;;  %635 = vmatprep.subr.mxu1 %v409_v4  ;;  %v406_v8 = vld [vmem:[#allocation3 + $0x60] sm:$0xff]  ;;  %v405_v9 = vld [vmem:[#allocation3 + $0x58] sm:$0xff]  ;;  %v404_v10 = vld [vmem:[#allocation3 + $0x50] sm:$0xff] }
  0x21   : > { %s848_s13 = smov (!%p288_p0, %s594_s13), 3  ;;  %630 = vmatprep.subr.mxu0 %v301_v2  ;;  %636 = vmatpush3.msra.mxu1 %v409_v4  ;;  %v403_v11 = vld [vmem:[#allocation3 + $0x48] sm:$0xff]  ;;  %v402_v12 = vld [vmem:[#allocation3 + $0x40] sm:$0xff]  ;;  %v401_v13 = vld [vmem:[#allocation3 + $0x38] sm:$0xff] }
  0x22   : > { %s595_s14 = sshll.u32 %s848_s13, 3  ;;  %631 = vmatpush3.msra.mxu0 %v301_v2  ;;  %637 = vmatprep.subr.mxu1 %v408_v5  ;;  %v400_v14 = vld [vmem:[#allocation3 + $0x30] sm:$0xff]  ;;  %v399_v15 = vld [vmem:[#allocation3 + $0x28] sm:$0xff]  ;;  %v398_v16 = vld [vmem:[#allocation3 + $0x20] sm:$0xff] }
  0x23   : > { %s291_s17 = scalar_lea.vmem %s837_s0, %s595_s14  ;;  %638 = vmatpush3.msra.mxu1 %v408_v5  ;;  %v397_v17 = vld [vmem:[#allocation3 + $0x18] sm:$0xff]  ;;  %v396_v18 = vld [vmem:[#allocation3 + $0x10] sm:$0xff]  ;;  %v395_v19 = vld [vmem:[#allocation3 + $0x8] sm:$0xff]  ;;  %s297_s6 = scalar_lea.vmem %s844_s7, %s595_s14 }
  0x24   : > { %v299_v3 = vld [vmem:[%s291_s17] sm:$0xff]  ;;  %v300_v6 = vld [vmem:[%s291_s17 + $0x8] sm:$0xff]  ;;  %639 = vmatprep.subr.mxu1 %v407_v7 }
  0x25   : > { %632 = vmatprep.mubr.msk.f32.mxu0 %vm310_vm0, %v299_v3  ;;  %640 = vmatpush3.msra.mxu1 %v407_v7  ;;  %v394_v20 = vld [vmem:[#allocation3] sm:$0xff]  ;;  %v598_v21 = vld [vmem:[%s839_s2] ss:$0 sm:$0xff] }
  0x26   : > { %633 = vmatmul.mubr.msk.f32.vlgmr.msra.gmra.mxu0 %vm310_vm0, %v300_v6  ;;  %641 = vmatprep.subr.mxu1 %v406_v8  ;;  %v601_v29 = vld [vmem:[%s841_s4] ss:$0 sm:$0xff] }
  0x27   : > { %642 = vmatpush3.msra.mxu1 %v406_v8  ;;  %v602_v34 = vld [vmem:[%s842_s5] ss:$0 sm:$0xff] }
  0x28   : > { %643 = vmatprep.subr.mxu1 %v405_v9  ;;  %v603_v38 = vld [vmem:[#allocation2] ss:$0 sm:$0xff] }
  0x29   : > { %644 = vmatpush3.msra.mxu1 %v405_v9 }
  0x2a   : > { %645 = vmatprep.subr.mxu1 %v404_v10 }
  0x2b   : > { %646 = vmatpush3.msra.mxu1 %v404_v10 }
  0x2c   : > { %647 = vmatprep.subr.mxu1 %v403_v11 }
  0x2d   : > { %648 = vmatpush3.msra.mxu1 %v403_v11 }
  0x2e   : > { %649 = vmatprep.subr.mxu1 %v402_v12 }
  0x2f   : > { %650 = vmatpush3.msra.mxu1 %v402_v12 }
  0x30   : > { %651 = vmatprep.subr.mxu1 %v401_v13 }
  0x31   : > { %652 = vmatpush3.msra.mxu1 %v401_v13 }
  0x32   : > { %653 = vmatprep.subr.mxu1 %v400_v14 }
  0x33   : > { %654 = vmatpush3.msra.mxu1 %v400_v14 }
  0x34   : > { %655 = vmatprep.subr.mxu1 %v399_v15 }
  0x35   : > { %656 = vmatpush3.msra.mxu1 %v399_v15 }
  0x36   : > { %657 = vmatprep.subr.mxu1 %v398_v16 }
  0x37   : > { %658 = vmatpush3.msra.mxu1 %v398_v16 }
  0x38   : > { %659 = vmatprep.subr.mxu1 %v397_v17 }
  0x39   : > { %660 = vmatpush3.msra.mxu1 %v397_v17 }
  0x3a   : > { %661 = vmatprep.subr.mxu1 %v396_v18 }
  0x3b   : > { %662 = vmatpush3.msra.mxu1 %v396_v18 }
  0x3c   : > { %663 = vmatprep.subr.mxu1 %v395_v19 }
  0x3d   : > { %664 = vmatpush3.msra.mxu1 %v395_v19 }
  0x3e   : > { %665 = vmatprep.subr.mxu1 %v394_v20 }
  0x3f   : > { %666 = vmatpush3.msra.mxu1 %v394_v20 }
  0xe6   : > { %v634_v22 = vpop.f32.mrf.mxu0 }
  0xe7   : > { %v389_v23 = vadd.f32 %v634_v22, %v598_v21 }
  0xe8   : > { %v383_v24 = vpop.f32.mrf.mxu0 }
  0xe9   : > { %v384_v25 = vadd.f32 %v598_v21, %v383_v24  ;;  %v393_v27 = vmax.f32 %v389_v23, 0.0 }
  0xeb   : > { %v392_v26 = vmax.f32 %v384_v25, 0.0 }
  0xed   : > { %667 = vmatprep.mubr.f32.mxu1 %v392_v26 }
  0xee   : > { %668 = vmatmul.mubr.f32.vlgmr.msra.gmra.mxu1 %v393_v27 }
 0x1ae   : > { %v669_v28 = vpop.f32.mrf.mxu1 }
 0x1af   : > { %v489_v31 = vadd.f32 %v669_v28, %v601_v29 }
 0x1b0   : > { %v483_v30 = vpop.f32.mrf.mxu1 }
 0x1b1   : > { %v484_v32 = vadd.f32 %v601_v29, %v483_v30  ;;  %v493_v35 = vmax.f32 %v489_v31, 0.0 }
 0x1b3   : > { %v492_v33 = vmax.f32 %v484_v32, 0.0  ;;  %v502_v37 = vmul.f32 %v602_v34, %v493_v35 }
 0x1b5   : > { %v501_v36 = vmul.f32 %v602_v34, %v492_v33 }
 0x1b7   : > { %503 = vadd.xlane.f32.xlu0 %v501_v36 }
 0x1bb   : > { %505 = vadd.xlane.f32.xlu0 %v502_v37 }
 0x240   : > { %v504_v39 = vpop.xlane.xlu0 %503 }
 0x241   : > { %v514_v40 = vadd.f32 %v603_v38, %v504_v39 }
 0x243   : > { %517 = vst.msk [vmem:[%s297_s6] sm:$0xff] %vm516_vm1, %v514_v40 }
 0x244   : > { %v506_v41 = vpop.xlane.xlu0 %505 }
 0x245   : > { %v515_v42 = vadd.f32 %v603_v38, %v506_v41 }
 0x247   : > { %518 = vst.msk [vmem:[%s297_s6 + $0x8] sm:$0xff] %vm516_vm1, %v515_v42 }
 0x248 PF: > { %s20_s26 = sadd.s32 1, %s727_s26  }
 0x249   : > { %p17_p1 = scmp.ge.s32.totalorder %s20_s26, 4  }
 0x24b   :  { %19 = sbr.rel (!%p17_p1) target bundleno = 4 (0x4), region = 83 }
 0x250   :  { %541 = vsyncpa [#allocation4], 1 }
 0x251   :  { %543 = vsyncpa [#allocation4 + $0x1], 1 }

</bundles_post_ra>
